<compile_context>
chip_gen: v7x
topology: tpu7x:2x2x1
jax: 0.10.0
libtpu: 0.0.40
codegen_flags: <defaults>
</compile_context>

<pallas_src>
import jax
import jax.numpy as jnp
from jax import lax
from jax.experimental import pallas as pl
from jax.experimental.pallas import tpu as pltpu


def _nll_kernel(pred_ref, tgt_ref, num_ref, den_ref):
    c, tile = pred_ref.shape
    pred = pred_ref[...]                                   # (C, tile), native dtype
    tgt = tgt_ref[...].astype(jnp.int32)                   # (1, tile)
    # TODO(synk): once VALU-bound (v7x w/ bf16 pred), replace the per-step
    # sublane iota with a preloaded class-id operand.
    class_ids = lax.broadcasted_iota(jnp.int32, (c, tile), 0)
    hit = class_ids == tgt                                 # one-hot over classes
    masked = jnp.where(hit, pred, jnp.zeros_like(pred)).astype(jnp.float32)
    # Per-class lane reduction of this block only (VALU adds + tiny XLU tail);
    # no big accumulator load/store, nothing carried across grid steps.
    num_ref[...] = jnp.sum(masked, axis=1, keepdims=True)                   # (C, 1)
    den_ref[...] = jnp.sum(hit.astype(jnp.float32), axis=1, keepdims=True)  # (C, 1)


def _round_up(x, m):
    return ((x + m - 1) // m) * m


def _choose_tile(c, hw, pred_itemsize, target_block_bytes=2 * 1024 * 1024):
    """Pick a lane tile so one pred block is ~target_block_bytes (<=64K lanes)."""
    hw_cap = _round_up(hw, 128)
    tile = target_block_bytes // max(c * pred_itemsize, 1)
    tile = max(512, min(tile, 65536))
    tile = max(128, (tile // 128) * 128)
    return min(tile, hw_cap)


@jax.jit
def estimation_loss(pred_nchw, target, weights):
    """Weighted NLL loss == F.nll_loss(pred, target, weight=weights)."""
    n, c, h, w = pred_nchw.shape
    hw = h * w

    pred = pred_nchw.reshape(n, c, hw)                 # free reshape (contiguous)
    # Narrow target: 2 B/pixel HBM traffic instead of 4 (int8 would also work
    # for C <= 127; int16 keeps the lowering simple and covers any C here).
    tgt = target.reshape(n, 1, hw).astype(jnp.int16)

    tile = _choose_tile(c, hw, pred.dtype.itemsize)
    hw_pad = _round_up(hw, tile)
    if hw_pad != hw:
        pred = jnp.pad(pred, ((0, 0), (0, 0), (0, hw_pad - hw)))
        # padded pixels get target = -1 -> never match a class -> contribute 0
        tgt = jnp.pad(tgt, ((0, 0), (0, 0), (0, hw_pad - hw)), constant_values=-1)

    n_tiles = hw_pad // tile
    grid = (n, n_tiles)

    num, den = pl.pallas_call(
        _nll_kernel,
        out_shape=(
            jax.ShapeDtypeStruct((n, n_tiles, c, 1), jnp.float32),
            jax.ShapeDtypeStruct((n, n_tiles, c, 1), jnp.float32),
        ),
        grid=grid,
        in_specs=[
            # pred, native NCHW: (1, C, tile) block, leading dim squeezed.
            pl.BlockSpec((None, c, tile), lambda b, j: (b, 0, j)),
            # target: lane-dense (1, tile) int16 block.
            pl.BlockSpec((None, 1, tile), lambda b, j: (b, 0, j)),
        ],
        out_specs=(
            pl.BlockSpec((None, None, c, 1), lambda b, j: (b, j, 0, 0)),
            pl.BlockSpec((None, None, c, 1), lambda b, j: (b, j, 0, 0)),
        ),
        compiler_params=pltpu.CompilerParams(
            dimension_semantics=("parallel", "parallel"),
            vmem_limit_bytes=40 * 1024 * 1024,
        ),
    )(pred, tgt)

    # Class-weight multiply + final division in the wrapper (tiny XLA ops).
    num_pc = jnp.sum(num, axis=(0, 1))[:, 0]            # (C,) sum of pred where t==c
    den_pc = jnp.sum(den, axis=(0, 1))[:, 0]            # (C,) count where t==c
    w_f32 = weights.astype(jnp.float32)
    return -(w_f32 @ num_pc) / (w_f32 @ den_pc)


def _reference_nll(pred_nchw, target, weights):
    # pure-JAX reference of F.nll_loss(pred, target, weight=weights) (mean reduction)
    n, c, h, w = pred_nchw.shape
    pred_rows = jnp.transpose(pred_nchw, (0, 2, 3, 1)).reshape(-1, c).astype(jnp.float32)
    tgt = target.reshape(-1)
    gathered = pred_rows[jnp.arange(pred_rows.shape[0]), tgt]
    wsel = weights.astype(jnp.float32)[tgt]
    return -jnp.sum(wsel * gathered) / jnp.sum(wsel)


if __name__ == "__main__":
    key = jax.random.PRNGKey(0)
    k1, k2, k3, k4 = jax.random.split(key, 4)

    # main check: shapes implied by the module (NCHW log-probs + class map)
    N, C, H, W = 2, 4, 16, 16
    logits = jax.random.normal(k1, (N, C, H, W), dtype=jnp.float32)
    pred = jax.nn.log_softmax(logits, axis=1)
    target = jax.random.randint(k2, (N, H, W), 0, C, dtype=jnp.int32)
    # TODO(synk): weights come from np.load(cfg.training_cfg.weights_dir) in the
    # original module; use deterministic in-script per-class weights instead.
    weights = jnp.arange(1, C + 1, dtype=jnp.float32) / C

    loss = jax.block_until_ready(estimation_loss(pred, target, weights))
    ref = _reference_nll(pred, target, weights)
    assert jnp.allclose(loss, ref, rtol=1e-5, atol=1e-5), (loss, ref)

    # second check: odd spatial extent exercises the lane-padding path
    N2, C2, H2, W2 = 1, 5, 9, 7
    logits2 = jax.random.normal(k3, (N2, C2, H2, W2), dtype=jnp.float32)
    pred2 = jax.nn.log_softmax(logits2, axis=1)
    target2 = jax.random.randint(k4, (N2, H2, W2), 0, C2, dtype=jnp.int32)
    weights2 = jnp.arange(1, C2 + 1, dtype=jnp.float32) / C2
    loss2 = jax.block_until_ready(estimation_loss(pred2, target2, weights2))
    ref2 = _reference_nll(pred2, target2, weights2)
    assert jnp.allclose(loss2, ref2, rtol=1e-5, atol=1e-5), (loss2, ref2)

    # third check: bf16 log-probs (halved HBM traffic path), f32 accumulation
    pred_bf16 = pred.astype(jnp.bfloat16)
    loss3 = jax.block_until_ready(estimation_loss(pred_bf16, target, weights))
    ref3 = _reference_nll(pred_bf16.astype(jnp.float32), target, weights)
    assert jnp.allclose(loss3, ref3, rtol=1e-4, atol=1e-4), (loss3, ref3)

    print("KERNEL_OK")
</pallas_src>

<mosaic_0001>
module attributes {stable_mosaic.version = 11 : i64} {
  func.func @_nll_kernel(%arg0: i32, %arg1: i32, %arg2: memref<1x4x256xf32, #tpu.memory_space<vmem>>, %arg3: memref<1x1x256xi16, #tpu.memory_space<vmem>>, %arg4: memref<1x1x4x1xf32, #tpu.memory_space<vmem>>, %arg5: memref<1x1x4x1xf32, #tpu.memory_space<vmem>>) attributes {dimension_semantics = [#tpu.dimension_semantics<parallel>, #tpu.dimension_semantics<parallel>], iteration_bounds = array<i64: 2, 1>, scalar_prefetch = 0 : i64, scratch_operands = 0 : i64, tpu.core_type = #tpu.core_type<tc>, window_params = [{transform_indices = @transform_0, window_bounds = array<i64: 1, 4, 256>}, {transform_indices = @transform_1, window_bounds = array<i64: 1, 1, 256>}, {transform_indices = @transform_2, window_bounds = array<i64: 1, 1, 4, 1>}, {transform_indices = @transform_3, window_bounds = array<i64: 1, 1, 4, 1>}]} {
    %c0 = arith.constant 0 : index
    %c0_0 = arith.constant 0 : index
    %c0_1 = arith.constant 0 : index
    %0 = vector.load %arg2[%c0, %c0_0, %c0_1] : memref<1x4x256xf32, #tpu.memory_space<vmem>>, vector<1x4x256xf32>
    %1 = vector.shape_cast %0 : vector<1x4x256xf32> to vector<4x256xf32>
    %c0_2 = arith.constant 0 : index
    %c0_3 = arith.constant 0 : index
    %c0_4 = arith.constant 0 : index
    %2 = vector.load %arg3[%c0_2, %c0_3, %c0_4] : memref<1x1x256xi16, #tpu.memory_space<vmem>>, vector<1x1x256xi16>
    %3 = vector.shape_cast %2 : vector<1x1x256xi16> to vector<1x256xi16>
    %4 = arith.extsi %3 : vector<1x256xi16> to vector<1x256xi32>
    %5 = tpu.iota {dimensions = array<i32: 0>} : vector<4x256xi32>
    %6 = vector.broadcast %4 : vector<1x256xi32> to vector<4x256xi32>
    %7 = arith.cmpi eq, %5, %6 : vector<4x256xi32>
    %cst = arith.constant 0.000000e+00 : f32
    %8 = vector.broadcast %cst : f32 to vector<4x256xf32>
    %9 = arith.select %7, %1, %8 : vector<4x256xi1>, vector<4x256xf32>
    %cst_5 = arith.constant dense<0.000000e+00> : vector<4xf32>
    %10 = vector.multi_reduction <add>, %9, %cst_5 [1] : vector<4x256xf32> to vector<4xf32>
    %11 = vector.shape_cast %10 : vector<4xf32> to vector<4x1xf32>
    %c0_6 = arith.constant 0 : index
    %c0_7 = arith.constant 0 : index
    %c0_8 = arith.constant 0 : index
    %c0_9 = arith.constant 0 : index
    %12 = vector.load %arg4[%c0_6, %c0_7, %c0_8, %c0_9] : memref<1x1x4x1xf32, #tpu.memory_space<vmem>>, vector<1x1x4x1xf32>
    %13 = vector.shape_cast %12 : vector<1x1x4x1xf32> to vector<4x1xf32>
    %14 = vector.shape_cast %11 : vector<4x1xf32> to vector<1x1x4x1xf32>
    tpu.vector_store %arg4[%c0_6, %c0_7, %c0_8, %c0_9], %14 {strides = array<i32>} : memref<1x1x4x1xf32, #tpu.memory_space<vmem>>, vector<1x1x4x1xf32>,
    %15 = arith.extui %7 : vector<4x256xi1> to vector<4x256xi32>
    %16 = arith.sitofp %15 : vector<4x256xi32> to vector<4x256xf32>
    %cst_10 = arith.constant dense<0.000000e+00> : vector<4xf32>
    %17 = vector.multi_reduction <add>, %16, %cst_10 [1] : vector<4x256xf32> to vector<4xf32>
    %18 = vector.shape_cast %17 : vector<4xf32> to vector<4x1xf32>
    %c0_11 = arith.constant 0 : index
    %c0_12 = arith.constant 0 : index
    %c0_13 = arith.constant 0 : index
    %c0_14 = arith.constant 0 : index
    %19 = vector.load %arg5[%c0_11, %c0_12, %c0_13, %c0_14] : memref<1x1x4x1xf32, #tpu.memory_space<vmem>>, vector<1x1x4x1xf32>
    %20 = vector.shape_cast %19 : vector<1x1x4x1xf32> to vector<4x1xf32>
    %21 = vector.shape_cast %18 : vector<4x1xf32> to vector<1x1x4x1xf32>
    tpu.vector_store %arg5[%c0_11, %c0_12, %c0_13, %c0_14], %21 {strides = array<i32>} : memref<1x1x4x1xf32, #tpu.memory_space<vmem>>, vector<1x1x4x1xf32>,
    return
  }
  func.func @transform_0(%arg0: i32, %arg1: i32) -> (i32, i32, i32) {
    %c0_i32 = arith.constant 0 : i32
    %c0_i32_0 = arith.constant 0 : i32
    return %arg0, %c0_i32, %arg1 : i32, i32, i32
  }
  func.func @transform_1(%arg0: i32, %arg1: i32) -> (i32, i32, i32) {
    %c0_i32 = arith.constant 0 : i32
    %c0_i32_0 = arith.constant 0 : i32
    return %arg0, %c0_i32, %arg1 : i32, i32, i32
  }
  func.func @transform_2(%arg0: i32, %arg1: i32) -> (i32, i32, i32, i32) {
    %c0_i32 = arith.constant 0 : i32
    %c0_i32_0 = arith.constant 0 : i32
    %c0_i32_1 = arith.constant 0 : i32
    return %arg0, %arg1, %c0_i32, %c0_i32_0 : i32, i32, i32, i32
  }
  func.func @transform_3(%arg0: i32, %arg1: i32) -> (i32, i32, i32, i32) {
    %c0_i32 = arith.constant 0 : i32
    %c0_i32_0 = arith.constant 0 : i32
    %c0_i32_1 = arith.constant 0 : i32
    return %arg0, %arg1, %c0_i32, %c0_i32_0 : i32, i32, i32, i32
  }
}

</mosaic_0001>

<bundles_post_ra>
// kernel: estimation_loss.1
= control target key start
LH: loop header
LB: loop body
LE: loop exit
PB: predicated region body
PF: predicated region fallthrough
CT: control target
= control target key end

     0   :  { %s522_s12 = smov 0   ;;  %s524_s13 = smov 0   ;;  %s566_s0 = inlined_call_operand.vmem [shape: f32[2,4,256], index: 0, kind: input, shape index: {}]   ;;  %s567_s1 = inlined_call_operand.vmem [shape: s16[2,1,256], index: 1, kind: input, shape index: {}]   ;;  %s568_s2 = inlined_call_operand.vmem [shape: f32[2,1,4,1], index: 2, kind: output, shape index: {0}]   ;;  %s569_s3 = inlined_call_operand.vmem [shape: f32[2,1,4,1], index: 3, kind: output, shape index: {1}]  }
   0x1   :  { %s526_s14 = smov 0  }
   0x2 LB: > { %s26_s15 = sadd.s32 1, %s495_s13  ;;  %p440_p0 = scmp.ge.s32.totalorder %s499_s14, 1  ;;  %s499_s14 = sphi %s526_s14, %s14_s14   ;;  %s495_s13 = sphi %s524_s13, %s571_s13   ;;  %s491_s12 = sphi %s522_s12, %s570_s12  }
   0x3   : > { %p28_p1 = scmp.ge.s32.totalorder %s26_s15, 2  ;;  %p179_p2 = scmp.lt.s32.totalorder %s499_s14, 3 }
   0x5   : > { %s573_s15 = smov (%p28_p1, %s26_s15), 0  ;;  %p180_p3 = pnand %p440_p0, %p179_p2 }
   0x6   : > { %p225_p4 = scmp.lt.s32.totalorder (!%p180_p3), %s491_s12, 1  ;;  %v260_v0 = vlaneseq (!%p180_p3)  ;;  %vm285_vm0 = vcmask (!%p180_p3), 1043456   ;;  %v501_v14 = vmov (!%p180_p3), 0.0   ;;  %vm291_vm3 = vcmask (!%p180_p3), 3072  }
   0x7   : > { %183 = sbr.rel (%p180_p3) target bundleno = 176 (0xb0), region = 28 }
   0x8   : > { %v261_v1 = vshrl.u32 (!%p180_p3), %v260_v0, 7 }
   0xa   : > { %v264_v2 = vsub.s32 (!%p180_p3), 0, %v261_v1  ;;  %v268_v3 = vsub.s32 (!%p180_p3), 2, %v261_v1 }
   0xe   : > { %s575_s12 = smov (!%p225_p4, %s491_s12), 1 }
   0xf   : > { %s450_s16 = sshll.u32 %s575_s12, 3  ;;  %s443_s17 = sshll.u32 %s575_s12, 1 }
  0x10   : > { %s232_s20 = scalar_lea.vmem %s566_s0, %s450_s16  ;;  %s241_s23 = scalar_lea.vmem %s567_s1, %s443_s17 }
  0x11   : > { %v258_v4 = vld [vmem:[%s241_s23] sm:$0x3]  ;;  %s444_s24 = sshll.u32 %s575_s12, 2 }
  0x12   : > { %v257_v5 = vld [vmem:[%s232_s20] sm:$0xff]  ;;  %v259_v6 = vunpack.c.l.b16 %v258_v4  ;;  %s249_s27 = scalar_lea.vmem %s568_s2, %s444_s24  ;;  %s256_s30 = scalar_lea.vmem %s569_s3, %s444_s24 }
  0x13   : > { %v281_v9 = vcombine.high %v257_v5, %v257_v5 }
  0x14   : > { %v265_v7 = vrot.slane %v259_v6, %v264_v2  ;;  %v269_v8 = vrot.slane %v259_v6, %v268_v3 }
  0x16   : > { %v273_v10 = vrot.slane %v265_v7, %v264_v2  ;;  %v277_v11 = vrot.slane %v269_v8, %v264_v2 }
  0x18   : > { %vm278_vm1 = vcmp.eq.s32.totalorder %v261_v1, %v273_v10  ;;  %vm279_vm2 = vcmp.eq.s32.totalorder %v261_v1, %v277_v11 }
  0x19   : > { %v283_v12 = vsel %vm278_vm1, %v257_v5, 0.0  ;;  %v284_v13 = vsel %vm279_vm2, %v281_v9, 0.0  ;;  %v446_v15 = vsel %vm278_vm1, 1.0, %v501_v14  ;;  %v447_v16 = vsel %vm279_vm2, 1.0, %v501_v14 }
  0x1a   : > { %v286_v17 = vsel %vm285_vm0, %v283_v12, 0.0  ;;  %v287_v18 = vsel %vm285_vm0, %v284_v13, 0.0  ;;  %v297_v19 = vsel %vm285_vm0, %v446_v15, 0.0  ;;  %v298_v20 = vsel %vm285_vm0, %v447_v16, 0.0 }
  0x1b   : > { %v288_v21 = vadd.f32 %v287_v18, %v286_v17  ;;  %v299_v22 = vadd.f32 %v298_v20, %v297_v19 }
  0x1d   : > { %289 = vadd.xlane.f32.xlu0 %v288_v21 }
  0x21   : > { %300 = vadd.xlane.f32.xlu0 %v299_v22 }
  0xaa   : > { %v290_v23 = vpop.xlane.xlu0 %289 }
  0xab   : > { %292 = vst.msk [vmem:[%s249_s27] sm:$0xf] %vm291_vm3, %v290_v23 }
  0xae   : > { %v301_v24 = vpop.xlane.xlu0 %300 }
  0xaf   : > { %302 = vst.msk [vmem:[%s256_s30] sm:$0xf] %vm291_vm3, %v301_v24 }
  0xb0 PF: > { %s14_s14 = sadd.s32 1, %s499_s14   ;;  %s570_s12 = smov %s495_s13 }
  0xb1   : > { %p11_p5 = scmp.ge.s32.totalorder %s14_s14, 4   ;;  %s571_s13 = smov %s573_s15 }
  0xb3   :  { %13 = sbr.rel (!%p11_p5) target bundleno = 2 (0x2), region = 73 }

</bundles_post_ra>
